<compile_context>
chip_gen: v7x
topology: tpu7x:2x2x1
jax: 0.10.0
libtpu: 0.0.40
codegen_flags: <defaults>
</compile_context>

<pallas_src>
import functools

import jax
import jax.numpy as jnp
from jax.experimental import pallas as pl
from jax.experimental.pallas import tpu as pltpu


def _round_up(x, m):
    return (x + m - 1) // m * m


# ----------------------------------------------------------------------------- kernel
def _fused_mlp_kernel(x_ref, t1_ref, b1_ref, w2_ref, b2_ref, w3_ref, b3_ref, o_ref,
                      *, vocab, num_features):
    tb = x_ref.shape[0]
    fvp = t1_ref.shape[0]                     # padded F*V contraction dim

    # Build one-hot block for the fused Embedding+Flatten+Linear1 table.
    lane = jax.lax.broadcasted_iota(jnp.int32, (tb, fvp), 1)
    x = x_ref[...]                            # (tb, F) int32 token indices
    onehot = jnp.zeros((tb, fvp), jnp.float32)
    for f in range(num_features):             # static unroll (F is small)
        sel = x[:, f:f + 1] + f * vocab       # (tb, 1)
        onehot = onehot + (lane == sel).astype(jnp.float32)

    # Layer 1: (Embedding @ W1*bn_scale) lookup via one-hot matmul, folded bias, ReLU.
    h = jnp.dot(onehot.astype(jnp.bfloat16), t1_ref[...],
                preferred_element_type=jnp.float32)
    h = jnp.maximum(h + b1_ref[...], 0.0)

    # Layer 2: Linear (BN folded) + ReLU.
    h = jnp.dot(h.astype(jnp.bfloat16), w2_ref[...],
                preferred_element_type=jnp.float32)
    h = jnp.maximum(h + b2_ref[...], 0.0)

    # Layer 3: Linear + Sigmoid.
    z = jnp.dot(h.astype(jnp.bfloat16), w3_ref[...],
                preferred_element_type=jnp.float32) + b3_ref[...]
    o_ref[...] = jax.nn.sigmoid(z)


# ------------------------------------------------------------------- parameter folding
def prepare_fused_params(raw, *, vocab, num_features, eps=1e-5):
    """Fold BN + bias into weights, fold Embedding+Flatten into Linear1, pad, cast bf16."""
    s1 = raw["gamma1"] / jnp.sqrt(raw["var1"] + eps)
    t1 = raw["beta1"] - raw["mean1"] * s1
    s2 = raw["gamma2"] / jnp.sqrt(raw["var2"] + eps)
    t2 = raw["beta2"] - raw["mean2"] * s2

    w1 = raw["w1"] * s1[None, :]              # (F*E, H1) column-scaled
    b1 = raw["b1"] * s1 + t1                  # (H1,)
    w2 = raw["w2"] * s2[None, :]              # (H1, H2)
    b2 = raw["b2"] * s2 + t2
    w3, b3 = raw["w3"], raw["b3"]             # (H2, O), (O,)

    emb = raw["emb"]                          # (V, E)
    V, E = emb.shape
    F = num_features
    h1 = w1.shape[1]
    # T[f*V + v, h] = sum_e emb[v, e] * w1[f*E + e, h]   (Embedding+Flatten+Linear1)
    T = jnp.einsum("ve,feh->fvh", emb, w1.reshape(F, E, h1)).reshape(F * V, h1)

    FVP = _round_up(F * V, 128)
    H1P = _round_up(h1, 128)
    H2P = _round_up(w2.shape[1], 128)
    NOP = _round_up(w3.shape[1], 128)

    def pad2(a, rows, cols):
        return jnp.pad(a, ((0, rows - a.shape[0]), (0, cols - a.shape[1])))

    return {
        "t1": pad2(T, FVP, H1P).astype(jnp.bfloat16),
        "b1": pad2(b1[None, :], 1, H1P).astype(jnp.float32),
        "w2": pad2(w2, H1P, H2P).astype(jnp.bfloat16),
        "b2": pad2(b2[None, :], 1, H2P).astype(jnp.float32),
        "w3": pad2(w3, H2P, NOP).astype(jnp.bfloat16),
        "b3": pad2(b3[None, :], 1, NOP).astype(jnp.float32),
    }


# --------------------------------------------------------------------------- forward
def neural_net_forward(x_idx, fused, *, vocab, num_features, num_outputs, tile_b=256):
    B, F = x_idx.shape
    assert F == num_features

    tb = min(tile_b, _round_up(B, 8))         # sublane-aligned batch tile
    b_pad = _round_up(B, tb)
    x_pad = jnp.pad(x_idx.astype(jnp.int32), ((0, b_pad - B), (0, 0)))

    FVP, H1P = fused["t1"].shape
    H2P = fused["w2"].shape[1]
    NOP = fused["w3"].shape[1]

    const = lambda i: (0, 0)                  # weights: VMEM-resident across grid steps
    out = pl.pallas_call(
        functools.partial(_fused_mlp_kernel, vocab=vocab, num_features=num_features),
        out_shape=jax.ShapeDtypeStruct((b_pad, NOP), jnp.float32),
        grid=(b_pad // tb,),
        in_specs=[
            pl.BlockSpec((tb, num_features), lambda i: (i, 0)),   # token indices
            pl.BlockSpec((FVP, H1P), const),
            pl.BlockSpec((1, H1P), const),
            pl.BlockSpec((H1P, H2P), const),
            pl.BlockSpec((1, H2P), const),
            pl.BlockSpec((H2P, NOP), const),
            pl.BlockSpec((1, NOP), const),
        ],
        out_specs=pl.BlockSpec((tb, NOP), lambda i: (i, 0)),
        compiler_params=pltpu.CompilerParams(dimension_semantics=("parallel",)),
    )(x_pad, fused["t1"], fused["b1"], fused["w2"], fused["b2"],
      fused["w3"], fused["b3"])

    return out[:B, :num_outputs]


# -------------------------------------------------------------- raw params + reference
def _xavier_uniform(key, fan_in, fan_out):
    limit = (6.0 / (fan_in + fan_out)) ** 0.5
    # stored as (in, out) — transpose of PyTorch's (out, in) Linear weight
    return jax.random.uniform(key, (fan_in, fan_out), jnp.float32, -limit, limit)


def init_raw_params(key, vocal_size, num_features, num_outputs, h1, h2):
    embedding_dim = int(vocal_size ** 0.25)
    d_in = embedding_dim * num_features
    k_emb, k1, k2, k3 = jax.random.split(key, 4)
    return {
        "emb": jax.random.normal(k_emb, (vocal_size, embedding_dim), jnp.float32),
        "w1": _xavier_uniform(k1, d_in, h1), "b1": jnp.zeros((h1,), jnp.float32),
        "gamma1": jnp.ones((h1,), jnp.float32), "beta1": jnp.zeros((h1,), jnp.float32),
        "mean1": jnp.zeros((h1,), jnp.float32), "var1": jnp.ones((h1,), jnp.float32),
        "w2": _xavier_uniform(k2, h1, h2), "b2": jnp.zeros((h2,), jnp.float32),
        "gamma2": jnp.ones((h2,), jnp.float32), "beta2": jnp.zeros((h2,), jnp.float32),
        "mean2": jnp.zeros((h2,), jnp.float32), "var2": jnp.ones((h2,), jnp.float32),
        "w3": _xavier_uniform(k3, h2, num_outputs),
        "b3": jnp.zeros((num_outputs,), jnp.float32),
    }


def reference_forward(x_idx, raw, eps=1e-5):
    emb = jnp.take(raw["emb"], x_idx, axis=0)
    h = emb.reshape(emb.shape[0], -1) @ raw["w1"] + raw["b1"]
    h = (h - raw["mean1"]) / jnp.sqrt(raw["var1"] + eps) * raw["gamma1"] + raw["beta1"]
    h = jnp.maximum(h, 0.0)
    h = h @ raw["w2"] + raw["b2"]
    h = (h - raw["mean2"]) / jnp.sqrt(raw["var2"] + eps) * raw["gamma2"] + raw["beta2"]
    h = jnp.maximum(h, 0.0)
    return jax.nn.sigmoid(h @ raw["w3"] + raw["b3"])


if __name__ == "__main__":
    vocal_size, num_features, num_outputs = 81, 8, 4   # embedding_dim = int(81**0.25) = 3
    h1, h2 = 32, 32
    batch = 8

    key = jax.random.PRNGKey(0)
    k_params, k_x = jax.random.split(key)
    raw = init_raw_params(k_params, vocal_size, num_features, num_outputs, h1, h2)
    fused = prepare_fused_params(raw, vocab=vocal_size, num_features=num_features)
    x = jax.random.randint(k_x, (batch, num_features), 0, vocal_size, dtype=jnp.int32)

    out = neural_net_forward(x, fused, vocab=vocal_size,
                             num_features=num_features, num_outputs=num_outputs)
    jax.block_until_ready(out)

    assert out.shape == (batch, num_outputs)
    assert bool(jnp.all((out >= 0.0) & (out <= 1.0)))
    ref = reference_forward(x, raw)
    max_err = float(jnp.max(jnp.abs(out - ref)))
    assert max_err < 3e-2, f"max abs error {max_err}"
    print("KERNEL_OK")
</pallas_src>

<mosaic_0001>
module attributes {stable_mosaic.version = 11 : i64} {
  func.func @_fused_mlp_kernel(%arg0: i32, %arg1: memref<8x8xi32, #tpu.memory_space<vmem>>, %arg2: memref<768x128xbf16, #tpu.memory_space<vmem>>, %arg3: memref<1x128xf32, #tpu.memory_space<vmem>>, %arg4: memref<128x128xbf16, #tpu.memory_space<vmem>>, %arg5: memref<1x128xf32, #tpu.memory_space<vmem>>, %arg6: memref<128x128xbf16, #tpu.memory_space<vmem>>, %arg7: memref<1x128xf32, #tpu.memory_space<vmem>>, %arg8: memref<8x128xf32, #tpu.memory_space<vmem>>) attributes {dimension_semantics = [#tpu.dimension_semantics<parallel>], iteration_bounds = array<i64: 1>, scalar_prefetch = 0 : i64, scratch_operands = 0 : i64, tpu.core_type = #tpu.core_type<tc>, window_params = [{transform_indices = @transform_0, window_bounds = array<i64: 8, 8>}, {pipeline_mode = #tpu.pipeline_mode<synchronous>, transform_indices = @transform_1, window_bounds = array<i64: 768, 128>}, {pipeline_mode = #tpu.pipeline_mode<synchronous>, transform_indices = @transform_2, window_bounds = array<i64: 1, 128>}, {pipeline_mode = #tpu.pipeline_mode<synchronous>, transform_indices = @transform_3, window_bounds = array<i64: 128, 128>}, {pipeline_mode = #tpu.pipeline_mode<synchronous>, transform_indices = @transform_4, window_bounds = array<i64: 1, 128>}, {pipeline_mode = #tpu.pipeline_mode<synchronous>, transform_indices = @transform_5, window_bounds = array<i64: 128, 128>}, {pipeline_mode = #tpu.pipeline_mode<synchronous>, transform_indices = @transform_6, window_bounds = array<i64: 1, 128>}, {transform_indices = @transform_7, window_bounds = array<i64: 8, 128>}]} {
    %0 = tpu.iota {dimensions = array<i32: 1>} : vector<8x768xi32>
    %c0 = arith.constant 0 : index
    %c0_0 = arith.constant 0 : index
    %1 = vector.load %arg1[%c0, %c0_0] : memref<8x8xi32, #tpu.memory_space<vmem>>, vector<8x8xi32>
    %cst = arith.constant 0.000000e+00 : f32
    %2 = vector.broadcast %cst : f32 to vector<8x768xf32>
    %3 = vector.extract_strided_slice %1 {offsets = [0, 0], sizes = [8, 1], strides = [1, 1]} : vector<8x8xi32> to vector<8x1xi32>
    %c0_i32 = arith.constant 0 : i32
    %4 = vector.broadcast %c0_i32 : i32 to vector<8x1xi32>
    %5 = arith.addi %3, %4 : vector<8x1xi32>
    %6 = vector.broadcast %5 : vector<8x1xi32> to vector<8x768xi32>
    %7 = arith.cmpi eq, %0, %6 : vector<8x768xi32>
    %8 = arith.extui %7 : vector<8x768xi1> to vector<8x768xi32>
    %9 = arith.sitofp %8 : vector<8x768xi32> to vector<8x768xf32>
    %10 = arith.addf %2, %9 : vector<8x768xf32>
    %11 = vector.extract_strided_slice %1 {offsets = [0, 1], sizes = [8, 1], strides = [1, 1]} : vector<8x8xi32> to vector<8x1xi32>
    %c81_i32 = arith.constant 81 : i32
    %12 = vector.broadcast %c81_i32 : i32 to vector<8x1xi32>
    %13 = arith.addi %11, %12 : vector<8x1xi32>
    %14 = vector.broadcast %13 : vector<8x1xi32> to vector<8x768xi32>
    %15 = arith.cmpi eq, %0, %14 : vector<8x768xi32>
    %16 = arith.extui %15 : vector<8x768xi1> to vector<8x768xi32>
    %17 = arith.sitofp %16 : vector<8x768xi32> to vector<8x768xf32>
    %18 = arith.addf %10, %17 : vector<8x768xf32>
    %19 = vector.extract_strided_slice %1 {offsets = [0, 2], sizes = [8, 1], strides = [1, 1]} : vector<8x8xi32> to vector<8x1xi32>
    %c162_i32 = arith.constant 162 : i32
    %20 = vector.broadcast %c162_i32 : i32 to vector<8x1xi32>
    %21 = arith.addi %19, %20 : vector<8x1xi32>
    %22 = vector.broadcast %21 : vector<8x1xi32> to vector<8x768xi32>
    %23 = arith.cmpi eq, %0, %22 : vector<8x768xi32>
    %24 = arith.extui %23 : vector<8x768xi1> to vector<8x768xi32>
    %25 = arith.sitofp %24 : vector<8x768xi32> to vector<8x768xf32>
    %26 = arith.addf %18, %25 : vector<8x768xf32>
    %27 = vector.extract_strided_slice %1 {offsets = [0, 3], sizes = [8, 1], strides = [1, 1]} : vector<8x8xi32> to vector<8x1xi32>
    %c243_i32 = arith.constant 243 : i32
    %28 = vector.broadcast %c243_i32 : i32 to vector<8x1xi32>
    %29 = arith.addi %27, %28 : vector<8x1xi32>
    %30 = vector.broadcast %29 : vector<8x1xi32> to vector<8x768xi32>
    %31 = arith.cmpi eq, %0, %30 : vector<8x768xi32>
    %32 = arith.extui %31 : vector<8x768xi1> to vector<8x768xi32>
    %33 = arith.sitofp %32 : vector<8x768xi32> to vector<8x768xf32>
    %34 = arith.addf %26, %33 : vector<8x768xf32>
    %35 = vector.extract_strided_slice %1 {offsets = [0, 4], sizes = [8, 1], strides = [1, 1]} : vector<8x8xi32> to vector<8x1xi32>
    %c324_i32 = arith.constant 324 : i32
    %36 = vector.broadcast %c324_i32 : i32 to vector<8x1xi32>
    %37 = arith.addi %35, %36 : vector<8x1xi32>
    %38 = vector.broadcast %37 : vector<8x1xi32> to vector<8x768xi32>
    %39 = arith.cmpi eq, %0, %38 : vector<8x768xi32>
    %40 = arith.extui %39 : vector<8x768xi1> to vector<8x768xi32>
    %41 = arith.sitofp %40 : vector<8x768xi32> to vector<8x768xf32>
    %42 = arith.addf %34, %41 : vector<8x768xf32>
    %43 = vector.extract_strided_slice %1 {offsets = [0, 5], sizes = [8, 1], strides = [1, 1]} : vector<8x8xi32> to vector<8x1xi32>
    %c405_i32 = arith.constant 405 : i32
    %44 = vector.broadcast %c405_i32 : i32 to vector<8x1xi32>
    %45 = arith.addi %43, %44 : vector<8x1xi32>
    %46 = vector.broadcast %45 : vector<8x1xi32> to vector<8x768xi32>
    %47 = arith.cmpi eq, %0, %46 : vector<8x768xi32>
    %48 = arith.extui %47 : vector<8x768xi1> to vector<8x768xi32>
    %49 = arith.sitofp %48 : vector<8x768xi32> to vector<8x768xf32>
    %50 = arith.addf %42, %49 : vector<8x768xf32>
    %51 = vector.extract_strided_slice %1 {offsets = [0, 6], sizes = [8, 1], strides = [1, 1]} : vector<8x8xi32> to vector<8x1xi32>
    %c486_i32 = arith.constant 486 : i32
    %52 = vector.broadcast %c486_i32 : i32 to vector<8x1xi32>
    %53 = arith.addi %51, %52 : vector<8x1xi32>
    %54 = vector.broadcast %53 : vector<8x1xi32> to vector<8x768xi32>
    %55 = arith.cmpi eq, %0, %54 : vector<8x768xi32>
    %56 = arith.extui %55 : vector<8x768xi1> to vector<8x768xi32>
    %57 = arith.sitofp %56 : vector<8x768xi32> to vector<8x768xf32>
    %58 = arith.addf %50, %57 : vector<8x768xf32>
    %59 = vector.extract_strided_slice %1 {offsets = [0, 7], sizes = [8, 1], strides = [1, 1]} : vector<8x8xi32> to vector<8x1xi32>
    %c567_i32 = arith.constant 567 : i32
    %60 = vector.broadcast %c567_i32 : i32 to vector<8x1xi32>
    %61 = arith.addi %59, %60 : vector<8x1xi32>
    %62 = vector.broadcast %61 : vector<8x1xi32> to vector<8x768xi32>
    %63 = arith.cmpi eq, %0, %62 : vector<8x768xi32>
    %64 = arith.extui %63 : vector<8x768xi1> to vector<8x768xi32>
    %65 = arith.sitofp %64 : vector<8x768xi32> to vector<8x768xf32>
    %66 = arith.addf %58, %65 : vector<8x768xf32>
    %67 = arith.truncf %66 : vector<8x768xf32> to vector<8x768xbf16>
    %c0_1 = arith.constant 0 : index
    %c0_2 = arith.constant 0 : index
    %68 = vector.load %arg2[%c0_1, %c0_2] : memref<768x128xbf16, #tpu.memory_space<vmem>>, vector<768x128xbf16>
    %cst_3 = arith.constant dense<0.000000e+00> : vector<8x128xf32>
    %69 = tpu.matmul %67, %68, %cst_3 {dimension_numbers = #tpu.dot_dimension_numbers<[1], [0], [0], [1], [0, 0, 1, 1], [], []>} : vector<8x768xbf16>, vector<768x128xbf16>, vector<8x128xf32> -> vector<8x128xf32>
    %c0_4 = arith.constant 0 : index
    %c0_5 = arith.constant 0 : index
    %70 = vector.load %arg3[%c0_4, %c0_5] : memref<1x128xf32, #tpu.memory_space<vmem>>, vector<1x128xf32>
    %71 = vector.broadcast %70 : vector<1x128xf32> to vector<8x128xf32>
    %72 = arith.addf %69, %71 : vector<8x128xf32>
    %cst_6 = arith.constant 0.000000e+00 : f32
    %73 = vector.broadcast %cst_6 : f32 to vector<8x128xf32>
    %74 = arith.maximumf %72, %73 : vector<8x128xf32>
    %75 = arith.truncf %74 : vector<8x128xf32> to vector<8x128xbf16>
    %c0_7 = arith.constant 0 : index
    %c0_8 = arith.constant 0 : index
    %76 = vector.load %arg4[%c0_7, %c0_8] : memref<128x128xbf16, #tpu.memory_space<vmem>>, vector<128x128xbf16>
    %cst_9 = arith.constant dense<0.000000e+00> : vector<8x128xf32>
    %77 = tpu.matmul %75, %76, %cst_9 {dimension_numbers = #tpu.dot_dimension_numbers<[1], [0], [0], [1], [0, 0, 1, 1], [], []>} : vector<8x128xbf16>, vector<128x128xbf16>, vector<8x128xf32> -> vector<8x128xf32>
    %c0_10 = arith.constant 0 : index
    %c0_11 = arith.constant 0 : index
    %78 = vector.load %arg5[%c0_10, %c0_11] : memref<1x128xf32, #tpu.memory_space<vmem>>, vector<1x128xf32>
    %79 = vector.broadcast %78 : vector<1x128xf32> to vector<8x128xf32>
    %80 = arith.addf %77, %79 : vector<8x128xf32>
    %cst_12 = arith.constant 0.000000e+00 : f32
    %81 = vector.broadcast %cst_12 : f32 to vector<8x128xf32>
    %82 = arith.maximumf %80, %81 : vector<8x128xf32>
    %83 = arith.truncf %82 : vector<8x128xf32> to vector<8x128xbf16>
    %c0_13 = arith.constant 0 : index
    %c0_14 = arith.constant 0 : index
    %84 = vector.load %arg6[%c0_13, %c0_14] : memref<128x128xbf16, #tpu.memory_space<vmem>>, vector<128x128xbf16>
    %cst_15 = arith.constant dense<0.000000e+00> : vector<8x128xf32>
    %85 = tpu.matmul %83, %84, %cst_15 {dimension_numbers = #tpu.dot_dimension_numbers<[1], [0], [0], [1], [0, 0, 1, 1], [], []>} : vector<8x128xbf16>, vector<128x128xbf16>, vector<8x128xf32> -> vector<8x128xf32>
    %c0_16 = arith.constant 0 : index
    %c0_17 = arith.constant 0 : index
    %86 = vector.load %arg7[%c0_16, %c0_17] : memref<1x128xf32, #tpu.memory_space<vmem>>, vector<1x128xf32>
    %87 = vector.broadcast %86 : vector<1x128xf32> to vector<8x128xf32>
    %88 = arith.addf %85, %87 : vector<8x128xf32>
    %89 = arith.negf %88 : vector<8x128xf32>
    %90 = math.exp %89 : vector<8x128xf32>
    %cst_18 = arith.constant 1.000000e+00 : f32
    %91 = vector.broadcast %cst_18 : f32 to vector<8x128xf32>
    %92 = arith.addf %91, %90 : vector<8x128xf32>
    %93 = arith.divf %91, %92 : vector<8x128xf32>
    %c0_19 = arith.constant 0 : index
    %c0_20 = arith.constant 0 : index
    %94 = vector.load %arg8[%c0_19, %c0_20] : memref<8x128xf32, #tpu.memory_space<vmem>>, vector<8x128xf32>
    tpu.vector_store %arg8[%c0_19, %c0_20], %93 {strides = array<i32>} : memref<8x128xf32, #tpu.memory_space<vmem>>, vector<8x128xf32>,
    return
  }
  func.func @transform_0(%arg0: i32) -> (i32, i32) {
    %c0_i32 = arith.constant 0 : i32
    %c0_i32_0 = arith.constant 0 : i32
    return %arg0, %c0_i32 : i32, i32
  }
  func.func @transform_1(%arg0: i32) -> (i32, i32) {
    %c0_i32 = arith.constant 0 : i32
    %c0_i32_0 = arith.constant 0 : i32
    %c0_i32_1 = arith.constant 0 : i32
    return %c0_i32, %c0_i32_0 : i32, i32
  }
  func.func @transform_2(%arg0: i32) -> (i32, i32) {
    %c0_i32 = arith.constant 0 : i32
    %c0_i32_0 = arith.constant 0 : i32
    %c0_i32_1 = arith.constant 0 : i32
    return %c0_i32, %c0_i32_0 : i32, i32
  }
  func.func @transform_3(%arg0: i32) -> (i32, i32) {
    %c0_i32 = arith.constant 0 : i32
    %c0_i32_0 = arith.constant 0 : i32
    %c0_i32_1 = arith.constant 0 : i32
    return %c0_i32, %c0_i32_0 : i32, i32
  }
  func.func @transform_4(%arg0: i32) -> (i32, i32) {
    %c0_i32 = arith.constant 0 : i32
    %c0_i32_0 = arith.constant 0 : i32
    %c0_i32_1 = arith.constant 0 : i32
    return %c0_i32, %c0_i32_0 : i32, i32
  }
  func.func @transform_5(%arg0: i32) -> (i32, i32) {
    %c0_i32 = arith.constant 0 : i32
    %c0_i32_0 = arith.constant 0 : i32
    %c0_i32_1 = arith.constant 0 : i32
    return %c0_i32, %c0_i32_0 : i32, i32
  }
  func.func @transform_6(%arg0: i32) -> (i32, i32) {
    %c0_i32 = arith.constant 0 : i32
    %c0_i32_0 = arith.constant 0 : i32
    %c0_i32_1 = arith.constant 0 : i32
    return %c0_i32, %c0_i32_0 : i32, i32
  }
  func.func @transform_7(%arg0: i32) -> (i32, i32) {
    %c0_i32 = arith.constant 0 : i32
    %c0_i32_0 = arith.constant 0 : i32
    return %arg0, %c0_i32 : i32, i32
  }
}

</mosaic_0001>

<bundles_post_ra>
// kernel: tpu_custom_call.1
= control target key start
LH: loop header
LB: loop body
LE: loop exit
PB: predicated region body
PF: predicated region fallthrough
CT: control target
= control target key end

     0   :  { %12 = vsyncpa [#allocation3], 0  ;;  %s1894_s0 = inlined_call_operand.hbm [shape: s32[8,8], index: 0, kind: input, shape index: {}]   ;;  %s1895_s1 = inlined_call_operand.hbm [shape: bf16[768,128], index: 1, kind: input, shape index: {}]   ;;  %s1896_s2 = inlined_call_operand.vmem [shape: f32[1,128], index: 2, kind: input, shape index: {}]   ;;  %s1897_s3 = inlined_call_operand.hbm [shape: bf16[128,128], index: 3, kind: input, shape index: {}]   ;;  %s1898_s4 = inlined_call_operand.vmem [shape: f32[1,128], index: 4, kind: input, shape index: {}]   ;;  %s1899_s5 = inlined_call_operand.hbm [shape: bf16[128,128], index: 5, kind: input, shape index: {}]   ;;  %s1900_s6 = inlined_call_operand.vmem [shape: f32[1,128], index: 6, kind: input, shape index: {}]   ;;  %s1901_s7 = inlined_call_operand.hbm [shape: f32[8,128], index: 7, kind: output, shape index: {}]  }
   0x1   :  { %13 = vsyncpa [#allocation6], 0 }
   0x2   :  { %14 = vsyncpa [#allocation9], 0 }
   0x3   :  { %15 = vsyncpa [#allocation4], 0  ;;  %s1531_s24 = smov [#allocation5]   ;;  %s1413_s28 = scalar_lea.hbm %s1895_s1, 6144 }
   0x4   :  { %s31_s25 = sshll.u32 %s1531_s24, 4  ;;  %p1414_p0 = scmp.ne.s32.totalorder %s1895_s1, %s1413_s28  ;;  %s32_s25 = int_to_ptr.vmem [resolvable:$true] %s31_s25 }
   0x5   :  { %p1417_p1 = scmp.lt.u32.totalorder %s1413_s28, %s1895_s1 }
   0x7   :  { %p1419_p2 = pnand %p1417_p1, %p1414_p0 }
   0x9   :  { %1422 = shalt.err (!%p1419_p2)
}
   0xa   :  { %s1423_s10 = scalar_lea.vmem %s32_s25, 6144  ;;  %p1428_p4 = scmp.lt.s32.totalorder %s32_s25, %s32_s25 }
   0xb   :  { %p1424_p3 = scmp.ne.s32.totalorder %s32_s25, %s1423_s10  ;;  %p1429_p5 = scmp.lt.s32.totalorder %s1423_s10, %s1423_s10 }
   0xd   :  { %p1430_p6 = por %p1429_p5, %p1428_p4 }
   0xf   :  { %p1431_p7 = pnand %p1430_p6, %p1424_p3 }
  0x11   :  { %1434 = shalt.err (!%p1431_p7)
}
  0x12   :  { %s1532_s11 = smov 64   ;;  %s1533_s12 = smov 4  }
  0x13   :  { %37 = dma.hbm_to_vmem [thread:$0]  %s1895_s1, 6144, %s32_s25, [#allocation6], %s1532_s11, %s1532_s11, %s1533_s12  }
  0x14   :  { %s1534_s15 = smov [#allocation2]   ;;  %s1535_s17 = smov [#allocation7]  }
  0x15   :  { %s22_s16 = sshll.u32 %s1534_s15, 4  ;;  %s45_s18 = sshll.u32 %s1535_s17, 4  ;;  %s23_s16 = int_to_ptr.vmem [resolvable:$true] %s22_s16  ;;  %s46_s18 = int_to_ptr.vmem [resolvable:$true] %s45_s18 }
  0x16   :  { %s1435_s21 = scalar_lea.hbm %s1894_s0, 128 }
  0x17   :  { %p1436_p8 = scmp.ne.s32.totalorder %s1894_s0, %s1435_s21  ;;  %p1439_p9 = scmp.lt.u32.totalorder %s1435_s21, %s1894_s0 }
  0x19   :  { %p1441_p10 = pnand %p1439_p9, %p1436_p8 }
  0x1b   :  { %1444 = shalt.err (!%p1441_p10)
}
  0x1c   :  { %s1445_s1 = scalar_lea.vmem %s23_s16, 128  ;;  %p1450_p12 = scmp.lt.s32.totalorder %s23_s16, %s23_s16 }
  0x1d   :  { %p1446_p11 = scmp.ne.s32.totalorder %s23_s16, %s1445_s1  ;;  %p1451_p13 = scmp.lt.s32.totalorder %s1445_s1, %s1445_s1 }
  0x1f   :  { %p1452_p0 = por %p1451_p13, %p1450_p12 }
  0x21   :  { %p1453_p1 = pnand %p1452_p0, %p1446_p11 }
  0x23   :  { %1456 = shalt.err (!%p1453_p1)
}
  0x24   :  { %25 = dma.hbm_to_vmem [thread:$0]  %s1894_s0, 128, %s23_s16, [#allocation3]  }
  0x25   :  { %s1457_s30 = scalar_lea.hbm %s1897_s3, 1024 }
  0x26   :  { %p1458_p2 = scmp.ne.s32.totalorder %s1897_s3, %s1457_s30  ;;  %p1461_p3 = scmp.lt.u32.totalorder %s1457_s30, %s1897_s3 }
  0x28   :  { %p1463_p4 = pnand %p1461_p3, %p1458_p2 }
  0x2a   :  { %1466 = shalt.err (!%p1463_p4)
}
  0x2b   :  { %s1467_s14 = scalar_lea.vmem %s46_s18, 1024  ;;  %p1472_p6 = scmp.lt.s32.totalorder %s46_s18, %s46_s18 }
  0x2c   :  { %p1468_p5 = scmp.ne.s32.totalorder %s46_s18, %s1467_s14  ;;  %p1473_p7 = scmp.lt.s32.totalorder %s1467_s14, %s1467_s14 }
  0x2e   :  { %p1474_p8 = por %p1473_p7, %p1472_p6 }
  0x30   :  { %p1475_p9 = pnand %p1474_p8, %p1468_p5 }
  0x32   :  { %1478 = shalt.err (!%p1475_p9)
}
  0x33   :  { %51 = dma.hbm_to_vmem [thread:$0]  %s1897_s3, 1024, %s46_s18, [#allocation6], %s1532_s11, %s1532_s11, %s1533_s12  }
  0x34   :  { %s1536_s16 = smov [#allocation8]   ;;  %s1479_s21 = scalar_lea.hbm %s1899_s5, 1024 }
  0x35   :  { %s59_s17 = sshll.u32 %s1536_s16, 4  ;;  %p1480_p10 = scmp.ne.s32.totalorder %s1899_s5, %s1479_s21  ;;  %s60_s17 = int_to_ptr.vmem [resolvable:$true] %s59_s17 }
  0x36   :  { %p1483_p11 = scmp.lt.u32.totalorder %s1479_s21, %s1899_s5 }
  0x38   :  { %p1485_p12 = pnand %p1483_p11, %p1480_p10 }
  0x3a   :  { %1488 = shalt.err (!%p1485_p12)
}
  0x3b   :  { %s1489_s1 = scalar_lea.vmem %s60_s17, 1024  ;;  %p1494_p0 = scmp.lt.s32.totalorder %s60_s17, %s60_s17 }
  0x3c   :  { %p1490_p13 = scmp.ne.s32.totalorder %s60_s17, %s1489_s1  ;;  %p1495_p1 = scmp.lt.s32.totalorder %s1489_s1, %s1489_s1 }
  0x3e   :  { %p1496_p2 = por %p1495_p1, %p1494_p0 }
  0x40   :  { %p1497_p3 = pnand %p1496_p2, %p1490_p13 }
  0x42   :  { %1500 = shalt.err (!%p1497_p3)
}
  0x43   :  { %65 = dma.hbm_to_vmem [thread:$0]  %s1899_s5, 1024, %s60_s17, [#allocation9], %s1532_s11, %s1532_s11, %s1533_s12  }
  0x44   :  { %1523 = dma.done.wait [#allocation3], 128  }
  0x45   :  { %1524 = vsyncadd [#allocation3], 4294967168 }
  0x46   :  { %1525 = dma.done.wait [#allocation6], 7168  }
  0x47   :  { %1526 = vsyncadd [#allocation6], 4294960128 }
  0x48   :  { %1527 = dma.done.wait [#allocation9], 1024  }
  0x49   :  { %1528 = vsyncadd [#allocation9], 4294966272  ;;  %v1537_v0 = vmov 0   ;;  %v1538_v1 = vmov 2   ;;  %v88_v2 = vld [vmem:[#allocation2] sm:$0xff]  ;;  %v1345_v4 = vld [vmem:[#allocation5 + $0x40] sm:$0xff]   ;;  %v81_v50 = vlaneseq }
  0x4a   :  { %1336 = vset.pattern.permute.xlu0 %v1537_v0  ;;  %1338 = vset.pattern.permute.xlu1 %v1538_v1  ;;  %v144_v3 = vadd.s32 162, %v88_v2  ;;  %v1346_v5 = vld [vmem:[#allocation5] sm:$0xff]   ;;  %v116_v6 = vadd.s32 81, %v88_v2  ;;  %v172_v8 = vadd.s32 243, %v88_v2  ;;  %v1539_v10 = vmov 1   ;;  %v1349_v11 = vld [vmem:[#allocation5 + $0x48] sm:$0xff]  }
  0x4b   :  { %90 = vperm.xlu0 %1336, %v88_v2   ;;  %v1347_v7 = vld [vmem:[#allocation5 + $0xc0] sm:$0xff]   ;;  %1195 = vmatprep.subr.bf16.mxu0 %v1345_v4  ;;  %v1350_v12 = vld [vmem:[#allocation5 + $0x8] sm:$0xff]   ;;  %v1540_v13 = vmov 3   ;;  %v228_v14 = vadd.s32 405, %v88_v2  ;;  %v200_v17 = vadd.s32 324, %v88_v2  ;;  %v1353_v18 = vld [vmem:[#allocation5 + $0x50] sm:$0xff]  }
  0x4c   :  { %146 = vperm.xlu1 %1338, %v144_v3   ;;  %1196 = vmatpush3.bf16.msra.mxu0 %v1346_v5  ;;  %v1348_v9 = vld [vmem:[#allocation5 + $0x80] sm:$0xff]   ;;  %v1351_v15 = vld [vmem:[#allocation5 + $0xc8] sm:$0xff]   ;;  %v1541_v19 = vmov 5   ;;  %v1354_v20 = vld [vmem:[#allocation5 + $0x10] sm:$0xff]   ;;  %v1542_v22 = vmov 4   ;;  %v256_v25 = vadd.s32 486, %v88_v2 }
  0x4d   :  { %1217 = vmatprep.subr.bf16.mxu1 %v1347_v7  ;;  %1197 = vmatprep.subr.bf16.mxu0 %v1349_v11  ;;  %v1352_v16 = vld [vmem:[#allocation5 + $0x88] sm:$0xff]   ;;  %v1355_v21 = vld [vmem:[#allocation5 + $0xd0] sm:$0xff]   ;;  %v1357_v24 = vld [vmem:[#allocation5 + $0x58] sm:$0xff]   ;;  %v1543_v28 = vmov 7   ;;  %v1544_v30 = vmov 6   ;;  %v284_v33 = vadd.s32 567, %v88_v2 }
  0x4e   :  { %1218 = vmatpush3.bf16.msra.mxu1 %v1348_v9  ;;  %v1356_v23 = vld [vmem:[#allocation5 + $0x90] sm:$0xff]   ;;  %v1358_v26 = vld [vmem:[#allocation5 + $0x18] sm:$0xff]   ;;  %v1361_v31 = vld [vmem:[#allocation5 + $0x60] sm:$0xff]   ;;  %v1545_v49 = vmov 0.0   ;;  %v1646_v51 = vand.u32 127, %v81_v50 }
  0x4f   :  { %1337 = vset.pattern.permute.xlu0 %v1539_v10  ;;  %1219 = vmatprep.subr.bf16.mxu1 %v1351_v15  ;;  %v1359_v27 = vld [vmem:[#allocation5 + $0xd8] sm:$0xff]   ;;  %v1362_v32 = vld [vmem:[#allocation5 + $0x20] sm:$0xff]   ;;  %v1365_v36 = vld [vmem:[#allocation5 + $0x68] sm:$0xff]  }
  0x50   :  { %118 = vperm.xlu0 %1337, %v116_v6   ;;  %1339 = vset.pattern.permute.xlu1 %v1540_v13  ;;  %v1360_v29 = vld [vmem:[#allocation5 + $0x98] sm:$0xff]   ;;  %v1363_v34 = vld [vmem:[#allocation5 + $0xe0] sm:$0xff]   ;;  %v1366_v37 = vld [vmem:[#allocation5 + $0x28] sm:$0xff]   ;;  %v1653_v54 = vadd.s32 128, %v1646_v51  ;;  %v1656_v55 = vadd.s32 256, %v1646_v51  ;;  %v1659_v56 = vadd.s32 384, %v1646_v51 }
  0x51   :  { %174 = vperm.xlu1 %1339, %v172_v8   ;;  %1198 = vmatpush3.bf16.msra.mxu0 %v1350_v12  ;;  %v1364_v35 = vld [vmem:[#allocation5 + $0xa0] sm:$0xff]   ;;  %v1367_v38 = vld [vmem:[#allocation5 + $0xe8] sm:$0xff]   ;;  %v1369_v40 = vld [vmem:[#allocation5 + $0x70] sm:$0xff]   ;;  %v1662_v57 = vadd.s32 640, %v1646_v51  ;;  %v1675_v59 = vadd.s32 512, %v1646_v51 }
  0x52   :  { %1220 = vmatpush3.bf16.msra.mxu1 %v1352_v16  ;;  %1199 = vmatprep.subr.bf16.mxu0 %v1353_v18  ;;  %v1368_v39 = vld [vmem:[#allocation5 + $0xa8] sm:$0xff]   ;;  %v1370_v41 = vld [vmem:[#allocation5 + $0x30] sm:$0xff]   ;;  %v1373_v44 = vld [vmem:[#allocation5 + $0x78] sm:$0xff]  }
  0x53   :  { %1221 = vmatprep.subr.bf16.mxu1 %v1355_v21  ;;  %v1371_v42 = vld [vmem:[#allocation5 + $0xf0] sm:$0xff]   ;;  %v1374_v45 = vld [vmem:[#allocation5 + $0x38] sm:$0xff]   ;;  %v1377_v48 = vld [vmem:[#allocation5 + $0x140] sm:$0xff]  }
  0x54   :  { %1341 = vset.pattern.permute.xlu0 %v1541_v19  ;;  %v1372_v43 = vld [vmem:[#allocation5 + $0xb0] sm:$0xff]   ;;  %v1375_v46 = vld [vmem:[#allocation5 + $0xf8] sm:$0xff]  }
  0x55   :  { %230 = vperm.xlu0 %1341, %v228_v14   ;;  %1340 = vset.pattern.permute.xlu1 %v1542_v22  ;;  %v1376_v47 = vld [vmem:[#allocation5 + $0xb8] sm:$0xff]  }
  0x56   :  { %1200 = vmatpush3.bf16.msra.mxu0 %v1354_v20  ;;  %202 = vperm.xlu1 %1340, %v200_v17  }
  0x57   :  { %1222 = vmatpush3.bf16.msra.mxu1 %v1356_v23  ;;  %1201 = vmatprep.subr.bf16.mxu0 %v1357_v24 }
  0x58   :  { %1223 = vmatprep.subr.bf16.mxu1 %v1359_v27 }
  0x59   :  { %1344 = vset.pattern.permute.xlu0 %v1543_v28 }
  0x5a   :  { %1202 = vmatpush3.bf16.msra.mxu0 %v1358_v26  ;;  %1342 = vset.pattern.permute.xlu1 %v1544_v30 }
  0x5b   :  { %258 = vperm.xlu1 %1342, %v256_v25   ;;  %1224 = vmatpush3.bf16.msra.mxu1 %v1360_v29 }
  0x5c   :  { %1203 = vmatprep.subr.bf16.mxu0 %v1361_v31  ;;  %1225 = vmatprep.subr.bf16.mxu1 %v1363_v34 }
  0x5e   :  { %1204 = vmatpush3.bf16.msra.mxu0 %v1362_v32 }
  0x5f   :  { %1343 = vset.pattern.permute.xlu1 %v1543_v28  ;;  %1226 = vmatpush3.bf16.msra.mxu1 %v1364_v35 }
  0x60   :  { %286 = vperm.xlu1 %1343, %v284_v33   ;;  %1205 = vmatprep.subr.bf16.mxu0 %v1365_v36 }
  0x61   :  { %1227 = vmatprep.subr.bf16.mxu1 %v1367_v38 }
  0x62   :  { %1206 = vmatpush3.bf16.msra.mxu0 %v1366_v37 }
  0x63   :  { %1228 = vmatpush3.bf16.msra.mxu1 %v1368_v39  ;;  %1207 = vmatprep.subr.bf16.mxu0 %v1369_v40 }
  0x64   :  { %1229 = vmatprep.subr.bf16.mxu1 %v1371_v42 }
  0x66   :  { %1208 = vmatpush3.bf16.msra.mxu0 %v1370_v41 }
  0x67   :  { %1230 = vmatpush3.bf16.msra.mxu1 %v1372_v43  ;;  %1209 = vmatprep.subr.bf16.mxu0 %v1373_v44 }
  0x68   :  { %1231 = vmatprep.subr.bf16.mxu1 %v1375_v46 }
  0x6a   :  { %1210 = vmatpush3.bf16.msra.mxu0 %v1374_v45 }
  0x6b   :  { %1232 = vmatpush3.bf16.msra.mxu1 %v1376_v47  ;;  %1239 = vmatprep.subr.bf16.mxu0 %v1377_v48 }
  0x6c   :  { %1279 = vmatprep.subr.bf16.mxu1 %v1545_v49 }
  0xca   :  { %v1648_v52 = vpop.permute.xlu0 %90 }
  0xcb   :  { %v1650_v53 = vpop.permute.xlu1 %146  ;;  %vm92_vm0 = vcmp.eq.s32.totalorder %v1646_v51, %v1648_v52  ;;  %vm93_vm1 = vcmp.eq.s32.totalorder %v1653_v54, %v1648_v52  ;;  %vm94_vm2 = vcmp.eq.s32.totalorder %v1656_v55, %v1648_v52  ;;  %vm95_vm3 = vcmp.eq.s32.totalorder %v1659_v56, %v1648_v52 }
  0xcc   :  { %vm97_vm4 = vcmp.eq.s32.totalorder %v1662_v57, %v1648_v52  ;;  %v1079_v61 = vsel %vm92_vm0, 1.0, %v1545_v49  ;;  %v1080_v62 = vsel %vm93_vm1, 1.0, %v1545_v49  ;;  %v1081_v63 = vsel %vm94_vm2, 1.0, %v1545_v49 }
  0xcd   :  { %v1082_v0 = vsel %vm95_vm3, 1.0, %v1545_v49  ;;  %v1084_v1 = vsel %vm97_vm4, 1.0, %v1545_v49  ;;  %vm148_vm9 = vcmp.eq.s32.totalorder %v1646_v51, %v1650_v53  ;;  %vm149_vm10 = vcmp.eq.s32.totalorder %v1653_v54, %v1650_v53 }
  0xce   :  { %vm150_vm11 = vcmp.eq.s32.totalorder %v1656_v55, %v1650_v53  ;;  %vm153_vm12 = vcmp.eq.s32.totalorder %v1662_v57, %v1650_v53  ;;  %vm151_vm0 = vcmp.eq.s32.totalorder %v1659_v56, %v1650_v53  ;;  %v1091_v7 = vsel %vm148_vm9, 1.0, %v1545_v49 }
  0xcf   :  { %v1668_v58 = vpop.permute.xlu0 %118  ;;  %v1093_v8 = vsel %vm150_vm11, 1.0, %v1545_v49  ;;  %v1721_v9 = vsel %vm153_vm12, 1.0, %v1545_v49  ;;  %v1092_v19 = vsel %vm149_vm10, 1.0, %v1545_v49  ;;  %v1094_v26 = vsel %vm151_vm0, 1.0, %v1545_v49 }
  0xd0   :  { %v1679_v60 = vpop.permute.xlu1 %174  ;;  %vm120_vm5 = vcmp.eq.s32.totalorder %v1646_v51, %v1668_v58  ;;  %vm122_vm6 = vcmp.eq.s32.totalorder %v1656_v55, %v1668_v58  ;;  %vm121_vm7 = vcmp.eq.s32.totalorder %v1653_v54, %v1668_v58  ;;  %vm125_vm8 = vcmp.eq.s32.totalorder %v1662_v57, %v1668_v58 }
  0xd1   :  { %vm123_vm13 = vcmp.eq.s32.totalorder %v1659_v56, %v1668_v58  ;;  %v1085_v2 = vsel %vm120_vm5, 1.0, %v1545_v49  ;;  %v1087_v3 = vsel %vm122_vm6, 1.0, %v1545_v49  ;;  %v1086_v4 = vsel %vm121_vm7, 1.0, %v1545_v49 }
  0xd2   :  { %v1090_v5 = vsel %vm125_vm8, 1.0, %v1545_v49  ;;  %vm176_vm14 = vcmp.eq.s32.totalorder %v1646_v51, %v1679_v60  ;;  %vm178_vm15 = vcmp.eq.s32.totalorder %v1656_v55, %v1679_v60  ;;  %vm181_vm1 = vcmp.eq.s32.totalorder %v1662_v57, %v1679_v60 }
  0xd3   :  { %v1088_v10 = vsel %vm123_vm13, 1.0, %v1545_v49  ;;  %v138_v11 = vadd.f32 %v1085_v2, %v1079_v61  ;;  %v140_v12 = vadd.f32 %v1087_v3, %v1081_v63  ;;  %v1726_v14 = vadd.f32 %v1090_v5, %v1084_v1 }
  0xd4   :  { %v1724_v13 = vpop.permute.xlu0 %230  ;;  %v1097_v15 = vsel %vm176_vm14, 1.0, %v1545_v49  ;;  %v1099_v16 = vsel %vm178_vm15, 1.0, %v1545_v49  ;;  %v139_v17 = vadd.f32 %v1086_v4, %v1080_v62  ;;  %v1731_v18 = vsel %vm181_vm1, 1.0, %v1545_v49 }
  0xd5   :  { %v1712_v6 = vpop.permute.xlu1 %202  ;;  %vm177_vm2 = vcmp.eq.s32.totalorder %v1653_v54, %v1679_v60  ;;  %vm232_vm5 = vcmp.eq.s32.totalorder %v1646_v51, %v1724_v13  ;;  %vm233_vm6 = vcmp.eq.s32.totalorder %v1653_v54, %v1724_v13  ;;  %v141_v24 = vadd.f32 %v1088_v10, %v1082_v0 }
  0xd6   :  { %vm205_vm3 = vcmp.eq.s32.totalorder %v1653_v54, %v1712_v6  ;;  %vm204_vm4 = vcmp.eq.s32.totalorder %v1646_v51, %v1712_v6  ;;  %v167_v21 = vadd.f32 %v1092_v19, %v139_v17  ;;  %vm206_vm7 = vcmp.eq.s32.totalorder %v1656_v55, %v1712_v6 }
  0xd7   :  { %v1098_v22 = vsel %vm177_vm2, 1.0, %v1545_v49  ;;  %v1104_v23 = vsel %vm205_vm3, 1.0, %v1545_v49  ;;  %vm179_vm9 = vcmp.eq.s32.totalorder %v1659_v56, %v1679_v60  ;;  %v1110_v27 = vsel %vm233_vm6, 1.0, %v1545_v49 }
  0xd8   :  { %v195_v25 = vadd.f32 %v1098_v22, %v167_v21  ;;  %v169_v28 = vadd.f32 %v1094_v26, %v141_v24  ;;  %vm207_vm10 = vcmp.eq.s32.totalorder %v1659_v56, %v1712_v6  ;;  %vm235_vm11 = vcmp.eq.s32.totalorder %v1659_v56, %v1724_v13 }
  0xd9   :  { %vm209_vm12 = vcmp.eq.s32.totalorder %v1662_v57, %v1712_v6  ;;  %v1100_v30 = vsel %vm179_vm9, 1.0, %v1545_v49  ;;  %v1106_v31 = vsel %vm207_vm10, 1.0, %v1545_v49  ;;  %v166_v35 = vadd.f32 %v1091_v7, %v138_v11 }
  0xda   :  { %v1745_v20 = vpop.permute.xlu1 %258  ;;  %v223_v29 = vadd.f32 %v1104_v23, %v195_v25  ;;  %v197_v34 = vadd.f32 %v1100_v30, %v169_v28  ;;  %v1112_v37 = vsel %vm235_vm11, 1.0, %v1545_v49  ;;  %v1103_v38 = vsel %vm204_vm4, 1.0, %v1545_v49  ;;  %v1380_v25 = vld [vmem:[#allocation5 + $0x108] sm:$0xff]   ;;  %v1382_v30 = vld [vmem:[#allocation5 + $0x110] sm:$0xff]  }
  0xdb   :  { %vm261_vm8 = vcmp.eq.s32.totalorder %v1653_v54, %v1745_v20  ;;  %vm263_vm13 = vcmp.eq.s32.totalorder %v1659_v56, %v1745_v20  ;;  %v194_v41 = vadd.f32 %v1097_v15, %v166_v35  ;;  %v1109_v44 = vsel %vm232_vm5, 1.0, %v1545_v49 }
  0xdc   :  { %v1116_v33 = vsel %vm261_vm8, 1.0, %v1545_v49  ;;  %v251_v36 = vadd.f32 %v1110_v27, %v223_v29  ;;  %v225_v40 = vadd.f32 %v1106_v31, %v197_v34  ;;  %v1118_v43 = vsel %vm263_vm13, 1.0, %v1545_v49  ;;  %v1381_v27 = vld [vmem:[#allocation5 + $0x150] sm:$0xff]  }
  0xdd   :  { %vm260_vm0 = vcmp.eq.s32.totalorder %v1646_v51, %v1745_v20  ;;  %vm234_vm1 = vcmp.eq.s32.totalorder %v1656_v55, %v1724_v13  ;;  %v222_v46 = vadd.f32 %v1103_v38, %v194_v41  ;;  %v1105_v62 = vsel %vm206_vm7, 1.0, %v1545_v49 }
  0xde   :  { %v279_v42 = vadd.f32 %v1116_v33, %v251_v36  ;;  %v253_v45 = vadd.f32 %v1112_v37, %v225_v40  ;;  %v1115_v50 = vsel %vm260_vm0, 1.0, %v1545_v49  ;;  %vm262_vm3 = vcmp.eq.s32.totalorder %v1656_v55, %v1745_v20  ;;  %v1383_v33 = vld [vmem:[#allocation5 + $0x158] sm:$0xff]   ;;  %v1386_v40 = vld [vmem:[#allocation5 + $0x120] sm:$0xff]  }
  0xdf   :  { %v1770_v32 = vpop.permute.xlu1 %286  ;;  %v250_v61 = vadd.f32 %v1109_v44, %v222_v46  ;;  %vm237_vm4 = vcmp.eq.s32.totalorder %v1662_v57, %v1724_v13  ;;  %v1111_v3 = vsel %vm234_vm1, 1.0, %v1545_v49  ;;  %v171_v4 = vadd.f32 %v1721_v9, %v1726_v14  ;;  %v1384_v36 = vld [vmem:[#allocation5 + $0x118] sm:$0xff]  }
  0xe0   :  { %vm289_vm14 = vcmp.eq.s32.totalorder %v1653_v54, %v1770_v32  ;;  %vm291_vm15 = vcmp.eq.s32.totalorder %v1659_v56, %v1770_v32  ;;  %vm288_vm2 = vcmp.eq.s32.totalorder %v1646_v51, %v1770_v32  ;;  %v168_v54 = vadd.f32 %v1093_v8, %v140_v12  ;;  %v1391_v46 = vld [vmem:[#allocation5 + $0x178] sm:$0xff]  }
  0xe1   :  { %v1122_v39 = vsel %vm289_vm14, 1.0, %v1545_v49  ;;  %v1124_v48 = vsel %vm291_vm15, 1.0, %v1545_v49  ;;  %v281_v56 = vadd.f32 %v1118_v43, %v253_v45  ;;  %v1121_v63 = vsel %vm288_vm2, 1.0, %v1545_v49  ;;  %v1388_v43 = vld [vmem:[#allocation5 + $0x128] sm:$0xff]   ;;  %v1390_v45 = vld [vmem:[#allocation5 + $0x130] sm:$0xff]  }
  0xe2   :  { %v307_v47 = vadd.f32 %v1122_v39, %v279_v42  ;;  %v196_v0 = vadd.f32 %v1099_v16, %v168_v54  ;;  %v278_v2 = vadd.f32 %v1115_v50, %v250_v61  ;;  %v1117_v7 = vsel %vm262_vm3, 1.0, %v1545_v49  ;;  %v1392_v50 = vld [vmem:[#allocation5 + $0x138] sm:$0xff]  }
  0xe3   :  { %v309_v1 = vadd.f32 %v1124_v48, %v281_v56  ;;  %vm290_vm5 = vcmp.eq.s32.totalorder %v1656_v55, %v1770_v32  ;;  %v1108_v8 = vsel %vm209_vm12, 1.0, %v1545_v49  ;;  %v199_v12 = vadd.f32 %v1731_v18, %v171_v4  ;;  %v1378_v55 = vld [vmem:[#allocation5 + $0x100] sm:$0xff]   ;;  %v1379_v18 = vld [vmem:[#allocation5 + $0x148] sm:$0xff]   ;;  %v1396_v61 = vld [vmem:[#allocation7 + $0x18] sm:$0xff]  }
  0xe4   :  { %v313_v51 = vpack.c.bf16 %v307_v47, %v307_v47  ;;  %v224_v5 = vadd.f32 %v1105_v62, %v196_v0  ;;  %v306_v11 = vadd.f32 %v1121_v63, %v278_v2  ;;  %vm265_vm6 = vcmp.eq.s32.totalorder %v1662_v57, %v1745_v20  ;;  %v1393_v56 = vld [vmem:[#allocation7] sm:$0xff]   ;;  %v1399_v63 = vld [vmem:[#allocation7 + $0x30] sm:$0xff]   ;;  %v1400_v0 = vld [vmem:[#allocation7 + $0x38] sm:$0xff]  }
  0xe5   :  { %v315_v10 = vpack.c.bf16 %v309_v1, %v309_v1  ;;  %vm96_vm7 = vcmp.eq.s32.totalorder %v1675_v59, %v1648_v52  ;;  %vm124_vm8 = vcmp.eq.s32.totalorder %v1675_v59, %v1668_v58  ;;  %v1114_v14 = vsel %vm237_vm4, 1.0, %v1545_v49  ;;  %v1397_v62 = vld [vmem:[#allocation7 + $0x20] sm:$0xff]   ;;  %v1402_v2 = vld [vmem:[#allocation8 + $0x8] sm:$0xff]   ;;  %v1404_v4 = vld [vmem:[#allocation8 + $0x18] sm:$0xff]  }
  0xe6   :  { %741 = vmatprep.mubr.bf16.mxu0 %v313_v51  ;;  %v252_v9 = vadd.f32 %v1111_v3, %v224_v5  ;;  %v312_v15 = vpack.c.bf16 %v306_v11, %v306_v11  ;;  %v1123_v16 = vsel %vm290_vm5, 1.0, %v1545_v49  ;;  %v227_v17 = vadd.f32 %v1108_v8, %v199_v12  ;;  %v1398_v51 = vld [vmem:[#allocation7 + $0x28] sm:$0xff]   ;;  %v1401_v1 = vld [vmem:[#allocation8] sm:$0xff]   ;;  %v1403_v3 = vld [vmem:[#allocation8 + $0x10] sm:$0xff]  }
  0xe7   :  { %781 = vmatprep.mubr.bf16.mxu1 %v315_v10  ;;  %vm293_vm9 = vcmp.eq.s32.totalorder %v1662_v57, %v1770_v32  ;;  %v1120_v19 = vsel %vm265_vm6, 1.0, %v1545_v49  ;;  %v1083_v21 = vsel %vm96_vm7, 1.0, %v1545_v49  ;;  %v1089_v22 = vsel %vm124_vm8, 1.0, %v1545_v49  ;;  %v1405_v5 = vld [vmem:[#allocation8 + $0x20] sm:$0xff]   ;;  %v1127_v11 = vld [vmem:[%s1896_s2] ss:$0 sm:$0xff] }
  0xe8   :  { %v280_v52 = vadd.f32 %v1117_v7, %v252_v9  ;;  %742 = vmatmul.mubr.bf16.vlgmr.msra.gmra.mrb[0].mxu0 %v312_v15  ;;  %v255_v58 = vadd.f32 %v1114_v14, %v227_v17  ;;  %v1126_v24 = vsel %vm293_vm9, 1.0, %v1545_v49  ;;  %vm152_vm10 = vcmp.eq.s32.totalorder %v1675_v59, %v1650_v53  ;;  %v1385_v53 = vld [vmem:[#allocation5 + $0x160] sm:$0xff]   ;;  %v1406_v7 = vld [vmem:[#allocation8 + $0x28] sm:$0xff]  }
  0xe9   :  { %1240 = vmatpush3.bf16.msra.mxu0 %v1378_v55  ;;  %v142_v57 = vadd.f32 %v1089_v22, %v1083_v21  ;;  %v1095_v34 = vsel %vm152_vm10, 1.0, %v1545_v49  ;;  %vm180_vm11 = vcmp.eq.s32.totalorder %v1675_v59, %v1679_v60  ;;  %vm208_vm12 = vcmp.eq.s32.totalorder %v1675_v59, %v1712_v6  ;;  %v1387_v60 = vld [vmem:[#allocation5 + $0x168] sm:$0xff]   ;;  %v1389_v6 = vld [vmem:[#allocation5 + $0x170] sm:$0xff]  }
  0xea   :  { %v308_v23 = vadd.f32 %v1123_v16, %v280_v52  ;;  %v283_v26 = vadd.f32 %v1120_v19, %v255_v58  ;;  %1241 = vmatprep.subr.bf16.mxu0 %v1379_v18  ;;  %v1101_v37 = vsel %vm180_vm11, 1.0, %v1545_v49  ;;  %v1107_v39 = vsel %vm208_vm12, 1.0, %v1545_v49 }
  0xeb   :  { %v170_v35 = vadd.f32 %v1095_v34, %v142_v57  ;;  %vm236_vm13 = vcmp.eq.s32.totalorder %v1675_v59, %v1724_v13  ;;  %vm264_vm14 = vcmp.eq.s32.totalorder %v1675_v59, %v1745_v20  ;;  %vm292_vm15 = vcmp.eq.s32.totalorder %v1675_v59, %v1770_v32  ;;  %v1394_v59 = vld [vmem:[#allocation7 + $0x8] sm:$0xff]   ;;  %v1395_v32 = vld [vmem:[#allocation7 + $0x10] sm:$0xff]   ;;  %v1408_v57 = vld [vmem:[#allocation8 + $0x38] sm:$0xff]  }
  0xec   :  { %v314_v28 = vpack.c.bf16 %v308_v23, %v308_v23  ;;  %v311_v29 = vadd.f32 %v1126_v24, %v283_v26  ;;  %v1113_v42 = vsel %vm236_vm13, 1.0, %v1545_v49  ;;  %v1119_v13 = vsel %vm264_vm14, 1.0, %v1545_v49 }
  0xed   :  { %1242 = vmatpush3.bf16.msra.mxu0 %v1380_v25  ;;  %v198_v38 = vadd.f32 %v1101_v37, %v170_v35  ;;  %v1125_v47 = vsel %vm292_vm15, 1.0, %v1545_v49  ;;  %vm1546_vm0 = vmmov 0   ;;  %v1185_v37 = vld [vmem:[%s1900_s6] ss:$0 sm:$0xff] }
  0xee   :  { %782 = vmatmul.mubr.bf16.vlgmr.msra.gmra.mrb[0].mxu1 %v314_v28  ;;  %v317_v31 = vpack.c.bf16 %v311_v29, %v311_v29  ;;  %1243 = vmatprep.subr.bf16.mxu0 %v1381_v27  ;;  %v1407_v28 = vld [vmem:[#allocation8 + $0x30] sm:$0xff]   ;;  %v1176_v29 = vld [vmem:[%s1898_s4] ss:$0 sm:$0xff]  ;;  %s1547_s4 = smov [#allocation10]  }
  0xef   :  { %v226_v41 = vadd.f32 %v1107_v39, %v198_v38  ;;  %1280 = vmatpush3.bf16.msra.mxu1 %v1393_v56  ;;  %1295 = vmatprep.mubr.msk.bf16.mxu1 %vm1546_vm0, %v1545_v49  ;;  %s1068_s28 = sshll.u32 %s1547_s4, 4  ;;  %s1069_s28 = int_to_ptr.vmem [resolvable:$true] %s1068_s28 }
  0xf0   :  { %821 = vmatprep.mubr.bf16.mxu0 %v317_v31  ;;  %1281 = vmatprep.subr.bf16.mxu1 %v1545_v49  ;;  %s1501_s29 = scalar_lea.vmem %s1069_s28, 128  ;;  %p1506_p5 = scmp.lt.s32.totalorder %s1069_s28, %s1069_s28 }
  0xf1   :  { %1244 = vmatpush3.bf16.msra.mxu0 %v1382_v30  ;;  %v254_v44 = vadd.f32 %v1113_v42, %v226_v41  ;;  %p1502_p4 = scmp.ne.s32.totalorder %s1069_s28, %s1501_s29  ;;  %p1507_p6 = scmp.lt.s32.totalorder %s1501_s29, %s1501_s29 }
  0xf2   :  { %1245 = vmatprep.subr.bf16.mxu0 %v1383_v33 }
  0xf3   :  { %v282_v48 = vadd.f32 %v1119_v13, %v254_v44  ;;  %1282 = vmatpush3.bf16.msra.mxu1 %v1394_v59  ;;  %p1508_p7 = por %p1507_p6, %p1506_p5 }
  0xf4   :  { %1283 = vmatprep.subr.bf16.mxu1 %v1545_v49 }
  0xf5   :  { %1246 = vmatpush3.bf16.msra.mxu0 %v1384_v36  ;;  %v310_v54 = vadd.f32 %v1125_v47, %v282_v48  ;;  %p1509_p8 = pnand %p1508_p7, %p1502_p4 }
  0xf6   :  { %1247 = vmatprep.subr.bf16.mxu0 %v1385_v53 }
  0xf7   :  { %v316_v20 = vpack.c.bf16 %v310_v54, %v310_v54  ;;  %1284 = vmatpush3.bf16.msra.mxu1 %v1395_v32 }
  0xf8   :  { %1285 = vmatprep.subr.bf16.mxu1 %v1545_v49 }
  0xf9   :  { %1248 = vmatpush3.bf16.msra.mxu0 %v1386_v40 }
  0xfa   :  { %1249 = vmatprep.subr.bf16.mxu0 %v1387_v60 }
  0xfb   :  { %1286 = vmatpush3.bf16.msra.mxu1 %v1396_v61 }
  0xfc   :  { %1287 = vmatprep.subr.bf16.mxu1 %v1545_v49 }
  0xfd   :  { %1250 = vmatpush3.bf16.msra.mxu0 %v1388_v43 }
  0xfe   :  { %1251 = vmatprep.subr.bf16.mxu0 %v1389_v6 }
  0xff   :  { %1288 = vmatpush3.bf16.msra.mxu1 %v1397_v62 }
 0x100   :  { %1289 = vmatprep.subr.bf16.mxu1 %v1545_v49 }
 0x101   :  { %1252 = vmatpush3.bf16.msra.mxu0 %v1390_v45 }
 0x102   :  { %1253 = vmatprep.subr.bf16.mxu0 %v1391_v46 }
 0x103   :  { %1290 = vmatpush3.bf16.msra.mxu1 %v1398_v51 }
 0x104   :  { %1291 = vmatprep.subr.bf16.mxu1 %v1545_v49 }
 0x105   :  { %1254 = vmatpush3.bf16.msra.mxu0 %v1392_v50 }
 0x106   :  { %1299 = vmatprep.subr.bf16.mxu0 %v1545_v49 }
 0x107   :  { %1292 = vmatpush3.bf16.msra.mxu1 %v1399_v63 }
 0x108   :  { %822 = vmatmul.mubr.bf16.vlgmr.msra.gmra.mrb[4].mxu0 %v316_v20  ;;  %1293 = vmatprep.subr.bf16.mxu1 %v1545_v49 }
 0x109   :  { %1315 = vmatprep.mubr.msk.bf16.mxu0 %vm1546_vm0, %v1545_v49  ;;  %1300 = vmatpush3.bf16.msra.mxu0 %v1401_v1 }
 0x10a   :  { %1301 = vmatprep.subr.bf16.mxu0 %v1545_v49 }
 0x10b   :  { %1294 = vmatpush3.bf16.msra.mxu1 %v1400_v0 }
 0x10d   :  { %1302 = vmatpush3.bf16.msra.mxu0 %v1402_v2 }
 0x10e   :  { %1303 = vmatprep.subr.bf16.mxu0 %v1545_v49 }
 0x111   :  { %1304 = vmatpush3.bf16.msra.mxu0 %v1403_v3 }
 0x112   :  { %1305 = vmatprep.subr.bf16.mxu0 %v1545_v49 }
 0x115   :  { %1306 = vmatpush3.bf16.msra.mxu0 %v1404_v4 }
 0x116   :  { %1307 = vmatprep.subr.bf16.mxu0 %v1545_v49 }
 0x119   :  { %1308 = vmatpush3.bf16.msra.mxu0 %v1405_v5 }
 0x11a   :  { %1309 = vmatprep.subr.bf16.mxu0 %v1545_v49 }
 0x11d   :  { %1310 = vmatpush3.bf16.msra.mxu0 %v1406_v7 }
 0x11e   :  { %1311 = vmatprep.subr.bf16.mxu0 %v1545_v49 }
 0x121   :  { %1312 = vmatpush3.bf16.msra.mxu0 %v1407_v28 }
 0x122   :  { %1313 = vmatprep.subr.bf16.mxu0 %v1545_v49 }
 0x125   :  { %1314 = vmatpush3.bf16.msra.mxu0 %v1408_v57 }
 0x1bb   :  { %v1211_v8 = vpop.f32.mrb[0].mxu0 }
 0x1bc   :  { %v1212_v10 = vpop.f32.mrb[1].mxu0 }
 0x1bd   :  { %v1213_v12 = vadd.f32 %v1212_v10, %v1211_v8  ;;  %v1214_v9 = vpop.f32.mrb[2].mxu0 }
 0x1be   :  { %v1215_v55 = vpop.f32.mrb[3].mxu0 }
 0x1bf   :  { %v744_v15 = vadd.f32 %v1213_v12, %v1127_v11 }
 0x1c1   :  { %v1233_v14 = vpop.f32.mrb[0].mxu1 }
 0x1c2   :  { %v1234_v16 = vpop.f32.mrb[1].mxu1 }
 0x1c3   :  { %v1235_v17 = vadd.f32 %v1234_v16, %v1233_v14  ;;  %v1236_v18 = vpop.f32.mrb[2].mxu1 }
 0x1c4   :  { %v1237_v52 = vpop.f32.mrb[3].mxu1 }
 0x1c5   :  { %v784_v19 = vadd.f32 %v1235_v17, %v744_v15 }
 0x1db   :  { %v1255_v58 = vpop.f32.mrb[4].mxu0 }
 0x1dc   :  { %v1256_v21 = vpop.f32.mrb[5].mxu0 }
 0x1dd   :  { %v1257_v22 = vadd.f32 %v1256_v21, %v1255_v58  ;;  %v1258_v23 = vpop.f32.mrb[6].mxu0 }
 0x1de   :  { %v1259_v24 = vpop.f32.mrb[7].mxu0 }
 0x1df   :  { %v824_v25 = vadd.f32 %v1257_v22, %v784_v19 }
 0x1e1   :  { %v829_v26 = vmax.f32 %v824_v25, 0.0 }
 0x1e3   :  { %v830_v27 = vpack.c.bf16 %v829_v26, %v829_v26 }
 0x1e5   :  { %1296 = vmatmul.mubr.bf16.vlgmr.msra.gmra.mrb[4].mxu1 %v830_v27 }
 0x2b8   :  { %v936_v30 = vpop.f32.mrb[4].mxu1 }
 0x2b9   :  { %v937_v31 = vadd.f32 %v1176_v29, %v936_v30  ;;  %v1297_v33 = vpop.f32.mrb[5].mxu1 }
 0x2ba   :  { %v939_v34 = vpop.f32.mrb[6].mxu1 }
 0x2bb   :  { %v942_v35 = vmax.f32 %v937_v31, 0.0  ;;  %v1298_v36 = vpop.f32.mrb[7].mxu1 }
 0x2bd   :  { %v943_v53 = vpack.c.bf16 %v942_v35, %v942_v35 }
 0x2bf   :  { %1316 = vmatmul.mubr.bf16.vlgmr.msra.gmra.mrb[8].mxu0 %v943_v53 }
 0x392   :  { %v1049_v38 = vpop.f32.mrb[8].mxu0 }
 0x393   :  { %v1050_v39 = vadd.f32 %v1185_v37, %v1049_v38  ;;  %v1317_v49 = vpop.f32.mrb[9].mxu0 }
 0x394   :  { %v1052_v40 = vpop.f32.mrb[10].mxu0 }
 0x395   :  { %v1194_v60 = vmul.f32 -1.442695, %v1050_v39  ;;  %v1318_v41 = vpop.f32.mrb[11].mxu0 }
 0x397   :  { %1409 = vpow2.f32 %v1194_v60 }
 0x3a1   :  { %v1410_v42 = vpop.eup %1409 }
 0x3a2   :  { %v1058_v43 = vadd.f32 1.0, %v1410_v42 }
 0x3a4   :  { %1411 = vrcp.f32 %v1058_v43 }
 0x3ae   :  { %v1412_v6 = vpop.eup %1411 }
 0x3af   :  { %1061 = vst [vmem:[#allocation10] sm:$0xff] %v1412_v6 }
 0x3b0   :  { %1512 = shalt.err (!%p1509_p8)
}
 0x3b1   :  { %s1513_s8 = scalar_lea.hbm %s1901_s7, 128 }
 0x3b2   :  { %p1514_p9 = scmp.ne.s32.totalorder %s1901_s7, %s1513_s8  ;;  %p1517_p10 = scmp.lt.u32.totalorder %s1513_s8, %s1901_s7 }
 0x3b4   :  { %p1519_p11 = pnand %p1517_p10, %p1514_p9 }
 0x3b6   :  { %1522 = shalt.err (!%p1519_p11)
}
 0x3b7   :  { %1071 = dma.vmem_to_hbm [thread:$0]  %s1069_s28, 128, %s1901_s7, [#allocation4]  }
 0x3b8   :  { %1529 = dma.done.wait [#allocation4], 128  }
 0x3b9   :  { %1530 = vsyncadd [#allocation4], 4294967168 }
 0x3ba   :  { %1075 = vsyncpa [#allocation3], 1 }
 0x3bb   :  { %1076 = vsyncpa [#allocation6], 1 }
 0x3bc   :  { %1077 = vsyncpa [#allocation9], 1 }
 0x3bd   :  { %1078 = vsyncpa [#allocation4], 1 }

</bundles_post_ra>
